<compile_context>
chip_gen: v7x
topology: tpu7x:2x2x1
jax: 0.10.0
libtpu: 0.0.40
codegen_flags: <defaults>
</compile_context>

<pallas_src>
import math

import jax
import jax.numpy as jnp
import numpy as np
from jax.experimental import pallas as pl
from jax.experimental.pallas import tpu as pltpu

# ----------------------------- config (small) --------------------------------
B, S, H = 2, 8, 64          # batch, seq, hidden
NH, KVH, D = 4, 2, 16       # heads, kv heads, head_dim  (H == NH * D)
I = 128                     # MLP intermediate size
EPS = 1e-6                  # rms_norm_eps
ROPE_THETA = 10000.0

G = NH // KVH               # GQA group size
M = B * S                   # rows after flattening batch into sublanes

# fused-QKV column offsets (after the rotate_half fold): [Q | K | V | Qrot | Krot]
QO, KO, VO = 0, NH * D, NH * D + KVH * D        # 0, 64, 96
RO = NH * D + 2 * KVH * D                       # 128 (start of rotated copies)
QKW = NH * D + KVH * D                          # 96  (width of the roped block)


# ------------------------------ fused Pallas kernel --------------------------
def decoder_layer_kernel(x_ref, ln1_ref, ln2_ref, wqkv_ref, wo_ref,
                         wgu_ref, wd_ref, cos_ref, sin_ref, mask_ref,
                         o_ref, attn_scr):
    x = x_ref[...]                                          # (M, H) fp32

    # ---- input RMSNorm (fp32) ----
    var = jnp.mean(x * x, axis=-1, keepdims=True)
    hn = x * jax.lax.rsqrt(var + EPS) * ln1_ref[...]        # (M, H)

    # ---- fused QKV (+ pre-rotated Q/K columns): one bf16 MXU matmul ----
    qkv = jnp.dot(hn.astype(jnp.bfloat16), wqkv_ref[...],
                  preferred_element_type=jnp.float32)       # (M, 224)

    # ---- RoPE as one lane-dense FMA (rotate_half folded into the weights) ----
    qk = qkv[:, :QKW] * cos_ref[...] + qkv[:, RO:RO + QKW] * sin_ref[...]
    # qk[:, :64]  = roped Q (heads 0..3), qk[:, 64:96] = roped K (kv heads 0..1)

    # ---- GQA causal attention, grouped per KV head (heads stacked on rows) ----
    scale = 1.0 / math.sqrt(D)
    mask = mask_ref[...]                                    # (G*M, M) block-causal
    for g in range(KVH):                                    # KVH=2, static unroll
        q_g = jnp.concatenate(
            [qk[:, (g * G + j) * D:(g * G + j + 1) * D] for j in range(G)],
            axis=0)                                         # (G*M, D)
        k_g = qk[:, KO + g * D:KO + (g + 1) * D]            # (M, D)
        v_g = qkv[:, VO + g * D:VO + (g + 1) * D]           # (M, D)

        s = jax.lax.dot_general(q_g, k_g, (((1,), (1,)), ((), ())),
                                preferred_element_type=jnp.float32) * scale
        s = s + mask                                        # (G*M, M)
        s = s - jnp.max(s, axis=-1, keepdims=True)
        p = jnp.exp(s)
        p = p * pl.reciprocal(jnp.sum(p, axis=-1, keepdims=True), approx=True)
        o_g = jnp.dot(p, v_g, preferred_element_type=jnp.float32)   # (G*M, D)

        # scatter group output into static lane slices of the (M, NH*D) scratch
        for j in range(G):
            h = g * G + j
            attn_scr[:, h * D:(h + 1) * D] = o_g[j * M:(j + 1) * M, :]

    # ---- o_proj + residual ----
    attn_out = jnp.dot(attn_scr[...].astype(jnp.bfloat16), wo_ref[...],
                       preferred_element_type=jnp.float32)  # (M, H)
    hid = x + attn_out

    # ---- post-attention RMSNorm ----
    var2 = jnp.mean(hid * hid, axis=-1, keepdims=True)
    hn2 = hid * jax.lax.rsqrt(var2 + EPS) * ln2_ref[...]

    # ---- fused gate/up MLP, SiLU, down proj ----
    gu = jnp.dot(hn2.astype(jnp.bfloat16), wgu_ref[...],
                 preferred_element_type=jnp.float32)        # (M, 2*I)
    g_ = gu[:, :I]
    u_ = gu[:, I:]
    act = (g_ * jax.nn.sigmoid(g_)) * u_                    # SiLU(g) * u, fp32
    mlp_out = jnp.dot(act.astype(jnp.bfloat16), wd_ref[...],
                      preferred_element_type=jnp.float32)   # (M, H)

    o_ref[...] = (hid + mlp_out).astype(o_ref.dtype)


# ------------------------------ wrapper ---------------------------------------
def decoder_layer(x, p, cos_t, sin_t, mask_g):
    b, s, h = x.shape
    x_flat = x.reshape(b * s, h)                            # free (contiguous)
    out_flat = pl.pallas_call(
        decoder_layer_kernel,
        out_shape=jax.ShapeDtypeStruct((b * s, h), jnp.float32),
        grid=(1,),
        in_specs=[
            pl.BlockSpec((b * s, h), lambda i: (0, 0)),     # x (flattened)
            pl.BlockSpec((1, h), lambda i: (0, 0)),         # ln1 weight
            pl.BlockSpec((1, h), lambda i: (0, 0)),         # ln2 weight
            pl.BlockSpec(p["wqkv"].shape, lambda i: (0, 0)),  # fused QKV(+rot)
            pl.BlockSpec(p["wo"].shape, lambda i: (0, 0)),    # o_proj weight
            pl.BlockSpec(p["wgu"].shape, lambda i: (0, 0)),   # fused gate/up
            pl.BlockSpec(p["wd"].shape, lambda i: (0, 0)),    # down proj
            pl.BlockSpec(cos_t.shape, lambda i: (0, 0)),      # tiled cos
            pl.BlockSpec(sin_t.shape, lambda i: (0, 0)),      # tiled sin
            pl.BlockSpec(mask_g.shape, lambda i: (0, 0)),     # block-causal mask
        ],
        out_specs=pl.BlockSpec((b * s, h), lambda i: (0, 0)),
        scratch_shapes=[pltpu.VMEM((b * s, NH * D), jnp.float32)],
    )(x_flat, p["ln1"], p["ln2"], p["wqkv"], p["wo"], p["wgu"], p["wd"],
      cos_t, sin_t, mask_g)
    return out_flat.reshape(b, s, h)                        # free (contiguous)


def _rotate_half_cols(w, n_heads):
    """Columns of w permuted/negated so x @ w_rot == rotate_half(x @ w)."""
    w4 = w.reshape(H, n_heads, 2, D // 2)
    rot = jnp.concatenate([-w4[:, :, 1, :], w4[:, :, 0, :]], axis=-1)
    return rot.reshape(H, n_heads * D)


def prepare_params(params):
    """One-time weight prep: fuse QKV(+rotated copies), gate/up; cast to bf16."""
    wq, wk, wv = params["wq"], params["wk"], params["wv"]
    wqkv = jnp.concatenate(
        [wq, wk, wv, _rotate_half_cols(wq, NH), _rotate_half_cols(wk, KVH)],
        axis=1).astype(jnp.bfloat16)                        # (H, 224)
    return {
        "ln1": params["ln1"].reshape(1, H),
        "ln2": params["ln2"].reshape(1, H),
        "wqkv": wqkv,
        "wo": params["wo"].astype(jnp.bfloat16),            # (64, 64)
        "wgu": jnp.concatenate(
            [params["wg"], params["wu"]], axis=1
        ).astype(jnp.bfloat16),                              # (H, 2*I) = (64, 256)
        "wd": params["wd"].astype(jnp.bfloat16),             # (I, H)
    }


def prepare_tables(cos, sin):
    """Tile RoPE tables over batch rows and (NH+KVH) heads; build causal mask."""
    cos_t = jnp.tile(cos, (B, NH + KVH))                    # (B*S, 96)
    sin_t = jnp.tile(sin, (B, NH + KVH))                    # (B*S, 96)
    row = jnp.arange(M)
    b_idx, s_idx = row // S, row % S
    allowed = (b_idx[:, None] == b_idx[None, :]) & (s_idx[None, :] <= s_idx[:, None])
    neg = jnp.float32(jnp.finfo(jnp.float32).min)
    mask_base = jnp.where(allowed, jnp.float32(0.0), neg)   # (M, M) block-causal
    mask_g = jnp.tile(mask_base, (G, 1))                    # (G*M, M) for stacked heads
    return cos_t, sin_t, mask_g


# ------------------------------ pure-JAX reference ----------------------------
def reference(x, params, cos, sin):
    def rms(v, w):
        var = jnp.mean(v * v, axis=-1, keepdims=True)
        return v * jax.lax.rsqrt(var + EPS) * w

    def rope(t):  # t: (B, heads, S, D)
        c = cos[None, None]
        s_ = sin[None, None]
        rot = jnp.concatenate([-t[..., D // 2:], t[..., : D // 2]], axis=-1)
        return t * c + rot * s_

    hn = rms(x, params["ln1"])
    q = (hn @ params["wq"]).reshape(B, S, NH, D).transpose(0, 2, 1, 3)
    k = (hn @ params["wk"]).reshape(B, S, KVH, D).transpose(0, 2, 1, 3)
    v = (hn @ params["wv"]).reshape(B, S, KVH, D).transpose(0, 2, 1, 3)
    q, k = rope(q), rope(k)
    k = jnp.repeat(k, NH // KVH, axis=1)
    v = jnp.repeat(v, NH // KVH, axis=1)
    neg = jnp.finfo(jnp.float32).min
    causal = jnp.triu(jnp.full((S, S), neg, jnp.float32), k=1)
    scores = jnp.einsum("bhqd,bhkd->bhqk", q, k) / math.sqrt(D) + causal
    p = jax.nn.softmax(scores, axis=-1)
    o = jnp.einsum("bhqk,bhkd->bhqd", p, v)
    o = o.transpose(0, 2, 1, 3).reshape(B, S, NH * D) @ params["wo"]
    hid = x + o
    hn2 = rms(hid, params["ln2"])
    m = (jax.nn.silu(hn2 @ params["wg"]) * (hn2 @ params["wu"])) @ params["wd"]
    return hid + m


# ----------------------------------- main -------------------------------------
if __name__ == "__main__":
    key = jax.random.PRNGKey(0)
    ks = jax.random.split(key, 10)

    x = jax.random.normal(ks[0], (B, S, H), dtype=jnp.float32)
    params = {
        "ln1": jnp.ones((H,), jnp.float32),
        "ln2": jnp.ones((H,), jnp.float32),
        "wq": 0.02 * jax.random.normal(ks[1], (H, NH * D), jnp.float32),
        "wk": 0.02 * jax.random.normal(ks[2], (H, KVH * D), jnp.float32),
        "wv": 0.02 * jax.random.normal(ks[3], (H, KVH * D), jnp.float32),
        "wo": 0.02 * jax.random.normal(ks[4], (NH * D, H), jnp.float32),
        "wg": 0.02 * jax.random.normal(ks[5], (H, I), jnp.float32),
        "wu": 0.02 * jax.random.normal(ks[6], (H, I), jnp.float32),
        "wd": 0.02 * jax.random.normal(ks[7], (I, H), jnp.float32),
    }

    # RoPE tables (LlamaRotaryEmbedding, default scaling = 1.0), shape (S, D).
    inv_freq = 1.0 / (ROPE_THETA ** (jnp.arange(0, D, 2, dtype=jnp.float32) / D))
    pos = jnp.arange(S, dtype=jnp.float32)
    freqs = pos[:, None] * inv_freq[None, :]
    emb = jnp.concatenate([freqs, freqs], axis=-1)
    cos = jnp.cos(emb).astype(jnp.float32)                   # (S, D)
    sin = jnp.sin(emb).astype(jnp.float32)                   # (S, D)

    fused = prepare_params(params)
    cos_t, sin_t, mask_g = prepare_tables(cos, sin)

    out = jax.jit(decoder_layer)(x, fused, cos_t, sin_t, mask_g)
    jax.block_until_ready(out)

    ref = reference(x, params, cos, sin)
    np.testing.assert_allclose(np.asarray(out), np.asarray(ref),
                               rtol=2e-2, atol=2e-2)

    print("KERNEL_OK")
</pallas_src>

<mosaic_0001>
module attributes {stable_mosaic.version = 11 : i64} {
  func.func @decoder_layer_kernel(%arg0: i32, %arg1: memref<16x64xf32, #tpu.memory_space<vmem>>, %arg2: memref<1x64xf32, #tpu.memory_space<vmem>>, %arg3: memref<1x64xf32, #tpu.memory_space<vmem>>, %arg4: memref<64x224xbf16, #tpu.memory_space<vmem>>, %arg5: memref<64x64xbf16, #tpu.memory_space<vmem>>, %arg6: memref<64x256xbf16, #tpu.memory_space<vmem>>, %arg7: memref<128x64xbf16, #tpu.memory_space<vmem>>, %arg8: memref<16x96xf32, #tpu.memory_space<vmem>>, %arg9: memref<16x96xf32, #tpu.memory_space<vmem>>, %arg10: memref<32x16xf32, #tpu.memory_space<vmem>>, %arg11: memref<16x64xf32, #tpu.memory_space<vmem>>, %arg12: memref<16x64xf32, #tpu.memory_space<vmem>>) attributes {dimension_semantics = [#tpu.dimension_semantics<arbitrary>], iteration_bounds = array<i64: 1>, scalar_prefetch = 0 : i64, scratch_operands = 1 : i64, tpu.core_type = #tpu.core_type<tc>, window_params = [{pipeline_mode = #tpu.pipeline_mode<synchronous>, transform_indices = @transform_0, window_bounds = array<i64: 16, 64>}, {pipeline_mode = #tpu.pipeline_mode<synchronous>, transform_indices = @transform_1, window_bounds = array<i64: 1, 64>}, {pipeline_mode = #tpu.pipeline_mode<synchronous>, transform_indices = @transform_2, window_bounds = array<i64: 1, 64>}, {pipeline_mode = #tpu.pipeline_mode<synchronous>, transform_indices = @transform_3, window_bounds = array<i64: 64, 224>}, {pipeline_mode = #tpu.pipeline_mode<synchronous>, transform_indices = @transform_4, window_bounds = array<i64: 64, 64>}, {pipeline_mode = #tpu.pipeline_mode<synchronous>, transform_indices = @transform_5, window_bounds = array<i64: 64, 256>}, {pipeline_mode = #tpu.pipeline_mode<synchronous>, transform_indices = @transform_6, window_bounds = array<i64: 128, 64>}, {pipeline_mode = #tpu.pipeline_mode<synchronous>, transform_indices = @transform_7, window_bounds = array<i64: 16, 96>}, {pipeline_mode = #tpu.pipeline_mode<synchronous>, transform_indices = @transform_8, window_bounds = array<i64: 16, 96>}, {pipeline_mode = #tpu.pipeline_mode<synchronous>, transform_indices = @transform_9, window_bounds = array<i64: 32, 16>}, {pipeline_mode = #tpu.pipeline_mode<synchronous>, transform_indices = @transform_10, window_bounds = array<i64: 16, 64>}]} {
    %c0 = arith.constant 0 : index
    %c0_0 = arith.constant 0 : index
    %0 = vector.load %arg1[%c0, %c0_0] : memref<16x64xf32, #tpu.memory_space<vmem>>, vector<16x64xf32>
    %1 = arith.mulf %0, %0 : vector<16x64xf32>
    %cst = arith.constant dense<0.000000e+00> : vector<16xf32>
    %2 = vector.multi_reduction <add>, %1, %cst [1] : vector<16x64xf32> to vector<16xf32>
    %3 = vector.shape_cast %2 : vector<16xf32> to vector<16x1xf32>
    %cst_1 = arith.constant 6.400000e+01 : f32
    %4 = vector.broadcast %cst_1 : f32 to vector<16x1xf32>
    %5 = arith.divf %3, %4 : vector<16x1xf32>
    %cst_2 = arith.constant 9.99999997E-7 : f32
    %6 = vector.broadcast %cst_2 : f32 to vector<16x1xf32>
    %7 = arith.addf %5, %6 : vector<16x1xf32>
    %8 = math.rsqrt %7 : vector<16x1xf32>
    %9 = vector.broadcast %8 : vector<16x1xf32> to vector<16x64xf32>
    %10 = arith.mulf %0, %9 : vector<16x64xf32>
    %c0_3 = arith.constant 0 : index
    %c0_4 = arith.constant 0 : index
    %11 = vector.load %arg2[%c0_3, %c0_4] : memref<1x64xf32, #tpu.memory_space<vmem>>, vector<1x64xf32>
    %12 = vector.broadcast %11 : vector<1x64xf32> to vector<16x64xf32>
    %13 = arith.mulf %10, %12 : vector<16x64xf32>
    %14 = arith.truncf %13 : vector<16x64xf32> to vector<16x64xbf16>
    %c0_5 = arith.constant 0 : index
    %c0_6 = arith.constant 0 : index
    %15 = vector.load %arg4[%c0_5, %c0_6] : memref<64x224xbf16, #tpu.memory_space<vmem>>, vector<64x224xbf16>
    %cst_7 = arith.constant dense<0.000000e+00> : vector<16x224xf32>
    %16 = tpu.matmul %14, %15, %cst_7 {dimension_numbers = #tpu.dot_dimension_numbers<[1], [0], [0], [1], [0, 0, 1, 1], [], []>} : vector<16x64xbf16>, vector<64x224xbf16>, vector<16x224xf32> -> vector<16x224xf32>
    %17 = vector.extract_strided_slice %16 {offsets = [0, 0], sizes = [16, 96], strides = [1, 1]} : vector<16x224xf32> to vector<16x96xf32>
    %c0_8 = arith.constant 0 : index
    %c0_9 = arith.constant 0 : index
    %18 = vector.load %arg8[%c0_8, %c0_9] : memref<16x96xf32, #tpu.memory_space<vmem>>, vector<16x96xf32>
    %19 = arith.mulf %17, %18 : vector<16x96xf32>
    %20 = vector.extract_strided_slice %16 {offsets = [0, 128], sizes = [16, 96], strides = [1, 1]} : vector<16x224xf32> to vector<16x96xf32>
    %c0_10 = arith.constant 0 : index
    %c0_11 = arith.constant 0 : index
    %21 = vector.load %arg9[%c0_10, %c0_11] : memref<16x96xf32, #tpu.memory_space<vmem>>, vector<16x96xf32>
    %22 = arith.mulf %20, %21 : vector<16x96xf32>
    %23 = arith.addf %19, %22 : vector<16x96xf32>
    %c0_12 = arith.constant 0 : index
    %c0_13 = arith.constant 0 : index
    %24 = vector.load %arg10[%c0_12, %c0_13] : memref<32x16xf32, #tpu.memory_space<vmem>>, vector<32x16xf32>
    %25 = vector.extract_strided_slice %23 {offsets = [0, 0], sizes = [16, 16], strides = [1, 1]} : vector<16x96xf32> to vector<16x16xf32>
    %26 = vector.extract_strided_slice %23 {offsets = [0, 16], sizes = [16, 16], strides = [1, 1]} : vector<16x96xf32> to vector<16x16xf32>
    %27 = tpu.concatenate %25, %26 in 0 : vector<16x16xf32>, vector<16x16xf32> -> vector<32x16xf32>
    %28 = vector.extract_strided_slice %23 {offsets = [0, 64], sizes = [16, 16], strides = [1, 1]} : vector<16x96xf32> to vector<16x16xf32>
    %29 = vector.extract_strided_slice %16 {offsets = [0, 96], sizes = [16, 16], strides = [1, 1]} : vector<16x224xf32> to vector<16x16xf32>
    %cst_14 = arith.constant dense<0.000000e+00> : vector<32x16xf32>
    %30 = tpu.matmul %27, %28, %cst_14 {dimension_numbers = #tpu.dot_dimension_numbers<[1], [1], [0], [0], [0, 0, 1, 0], [], []>} : vector<32x16xf32>, vector<16x16xf32>, vector<32x16xf32> -> vector<32x16xf32>
    %cst_15 = arith.constant 2.500000e-01 : f32
    %31 = vector.broadcast %cst_15 : f32 to vector<32x16xf32>
    %32 = arith.mulf %30, %31 : vector<32x16xf32>
    %33 = arith.addf %32, %24 : vector<32x16xf32>
    %cst_16 = arith.constant dense<0xFF800000> : vector<32xf32>
    %34 = vector.multi_reduction <maximumf>, %33, %cst_16 [1] : vector<32x16xf32> to vector<32xf32>
    %35 = vector.shape_cast %34 : vector<32xf32> to vector<32x1xf32>
    %36 = vector.broadcast %35 : vector<32x1xf32> to vector<32x16xf32>
    %37 = arith.subf %33, %36 : vector<32x16xf32>
    %38 = math.exp %37 : vector<32x16xf32>
    %cst_17 = arith.constant dense<0.000000e+00> : vector<32xf32>
    %39 = vector.multi_reduction <add>, %38, %cst_17 [1] : vector<32x16xf32> to vector<32xf32>
    %40 = vector.shape_cast %39 : vector<32xf32> to vector<32x1xf32>
    %41 = tpu.reciprocal %40 {approx = true} : vector<32x1xf32> -> vector<32x1xf32>
    %42 = vector.broadcast %41 : vector<32x1xf32> to vector<32x16xf32>
    %43 = arith.mulf %38, %42 : vector<32x16xf32>
    %cst_18 = arith.constant dense<0.000000e+00> : vector<32x16xf32>
    %44 = tpu.matmul %43, %29, %cst_18 {dimension_numbers = #tpu.dot_dimension_numbers<[1], [0], [0], [1], [0, 0, 1, 1], [], []>} : vector<32x16xf32>, vector<16x16xf32>, vector<32x16xf32> -> vector<32x16xf32>
    %45 = vector.extract_strided_slice %44 {offsets = [0, 0], sizes = [16, 16], strides = [1, 1]} : vector<32x16xf32> to vector<16x16xf32>
    %c0_19 = arith.constant 0 : index
    %c0_20 = arith.constant 0 : index
    %46 = vector.load %arg12[%c0_19, %c0_20] : memref<16x64xf32, #tpu.memory_space<vmem>>, vector<16x16xf32>
    tpu.vector_store %arg12[%c0_19, %c0_20], %45 {strides = array<i32>} : memref<16x64xf32, #tpu.memory_space<vmem>>, vector<16x16xf32>,
    %47 = vector.extract_strided_slice %44 {offsets = [16, 0], sizes = [16, 16], strides = [1, 1]} : vector<32x16xf32> to vector<16x16xf32>
    %c0_21 = arith.constant 0 : index
    %c16 = arith.constant 16 : index
    %48 = vector.load %arg12[%c0_21, %c16] : memref<16x64xf32, #tpu.memory_space<vmem>>, vector<16x16xf32>
    tpu.vector_store %arg12[%c0_21, %c16], %47 {strides = array<i32>} : memref<16x64xf32, #tpu.memory_space<vmem>>, vector<16x16xf32>,
    %49 = vector.extract_strided_slice %23 {offsets = [0, 32], sizes = [16, 16], strides = [1, 1]} : vector<16x96xf32> to vector<16x16xf32>
    %50 = vector.extract_strided_slice %23 {offsets = [0, 48], sizes = [16, 16], strides = [1, 1]} : vector<16x96xf32> to vector<16x16xf32>
    %51 = tpu.concatenate %49, %50 in 0 : vector<16x16xf32>, vector<16x16xf32> -> vector<32x16xf32>
    %52 = vector.extract_strided_slice %23 {offsets = [0, 80], sizes = [16, 16], strides = [1, 1]} : vector<16x96xf32> to vector<16x16xf32>
    %53 = vector.extract_strided_slice %16 {offsets = [0, 112], sizes = [16, 16], strides = [1, 1]} : vector<16x224xf32> to vector<16x16xf32>
    %cst_22 = arith.constant dense<0.000000e+00> : vector<32x16xf32>
    %54 = tpu.matmul %51, %52, %cst_22 {dimension_numbers = #tpu.dot_dimension_numbers<[1], [1], [0], [0], [0, 0, 1, 0], [], []>} : vector<32x16xf32>, vector<16x16xf32>, vector<32x16xf32> -> vector<32x16xf32>
    %cst_23 = arith.constant 2.500000e-01 : f32
    %55 = vector.broadcast %cst_23 : f32 to vector<32x16xf32>
    %56 = arith.mulf %54, %55 : vector<32x16xf32>
    %57 = arith.addf %56, %24 : vector<32x16xf32>
    %cst_24 = arith.constant dense<0xFF800000> : vector<32xf32>
    %58 = vector.multi_reduction <maximumf>, %57, %cst_24 [1] : vector<32x16xf32> to vector<32xf32>
    %59 = vector.shape_cast %58 : vector<32xf32> to vector<32x1xf32>
    %60 = vector.broadcast %59 : vector<32x1xf32> to vector<32x16xf32>
    %61 = arith.subf %57, %60 : vector<32x16xf32>
    %62 = math.exp %61 : vector<32x16xf32>
    %cst_25 = arith.constant dense<0.000000e+00> : vector<32xf32>
    %63 = vector.multi_reduction <add>, %62, %cst_25 [1] : vector<32x16xf32> to vector<32xf32>
    %64 = vector.shape_cast %63 : vector<32xf32> to vector<32x1xf32>
    %65 = tpu.reciprocal %64 {approx = true} : vector<32x1xf32> -> vector<32x1xf32>
    %66 = vector.broadcast %65 : vector<32x1xf32> to vector<32x16xf32>
    %67 = arith.mulf %62, %66 : vector<32x16xf32>
    %cst_26 = arith.constant dense<0.000000e+00> : vector<32x16xf32>
    %68 = tpu.matmul %67, %53, %cst_26 {dimension_numbers = #tpu.dot_dimension_numbers<[1], [0], [0], [1], [0, 0, 1, 1], [], []>} : vector<32x16xf32>, vector<16x16xf32>, vector<32x16xf32> -> vector<32x16xf32>
    %69 = vector.extract_strided_slice %68 {offsets = [0, 0], sizes = [16, 16], strides = [1, 1]} : vector<32x16xf32> to vector<16x16xf32>
    %c0_27 = arith.constant 0 : index
    %c32 = arith.constant 32 : index
    %70 = vector.load %arg12[%c0_27, %c32] : memref<16x64xf32, #tpu.memory_space<vmem>>, vector<16x16xf32>
    tpu.vector_store %arg12[%c0_27, %c32], %69 {strides = array<i32>} : memref<16x64xf32, #tpu.memory_space<vmem>>, vector<16x16xf32>,
    %71 = vector.extract_strided_slice %68 {offsets = [16, 0], sizes = [16, 16], strides = [1, 1]} : vector<32x16xf32> to vector<16x16xf32>
    %c0_28 = arith.constant 0 : index
    %c48 = arith.constant 48 : index
    %72 = vector.load %arg12[%c0_28, %c48] : memref<16x64xf32, #tpu.memory_space<vmem>>, vector<16x16xf32>
    tpu.vector_store %arg12[%c0_28, %c48], %71 {strides = array<i32>} : memref<16x64xf32, #tpu.memory_space<vmem>>, vector<16x16xf32>,
    %c0_29 = arith.constant 0 : index
    %c0_30 = arith.constant 0 : index
    %73 = vector.load %arg12[%c0_29, %c0_30] : memref<16x64xf32, #tpu.memory_space<vmem>>, vector<16x64xf32>
    %74 = arith.truncf %73 : vector<16x64xf32> to vector<16x64xbf16>
    %c0_31 = arith.constant 0 : index
    %c0_32 = arith.constant 0 : index
    %75 = vector.load %arg5[%c0_31, %c0_32] : memref<64x64xbf16, #tpu.memory_space<vmem>>, vector<64x64xbf16>
    %cst_33 = arith.constant dense<0.000000e+00> : vector<16x64xf32>
    %76 = tpu.matmul %74, %75, %cst_33 {dimension_numbers = #tpu.dot_dimension_numbers<[1], [0], [0], [1], [0, 0, 1, 1], [], []>} : vector<16x64xbf16>, vector<64x64xbf16>, vector<16x64xf32> -> vector<16x64xf32>
    %77 = arith.addf %0, %76 : vector<16x64xf32>
    %78 = arith.mulf %77, %77 : vector<16x64xf32>
    %cst_34 = arith.constant dense<0.000000e+00> : vector<16xf32>
    %79 = vector.multi_reduction <add>, %78, %cst_34 [1] : vector<16x64xf32> to vector<16xf32>
    %80 = vector.shape_cast %79 : vector<16xf32> to vector<16x1xf32>
    %cst_35 = arith.constant 6.400000e+01 : f32
    %81 = vector.broadcast %cst_35 : f32 to vector<16x1xf32>
    %82 = arith.divf %80, %81 : vector<16x1xf32>
    %cst_36 = arith.constant 9.99999997E-7 : f32
    %83 = vector.broadcast %cst_36 : f32 to vector<16x1xf32>
    %84 = arith.addf %82, %83 : vector<16x1xf32>
    %85 = math.rsqrt %84 : vector<16x1xf32>
    %86 = vector.broadcast %85 : vector<16x1xf32> to vector<16x64xf32>
    %87 = arith.mulf %77, %86 : vector<16x64xf32>
    %c0_37 = arith.constant 0 : index
    %c0_38 = arith.constant 0 : index
    %88 = vector.load %arg3[%c0_37, %c0_38] : memref<1x64xf32, #tpu.memory_space<vmem>>, vector<1x64xf32>
    %89 = vector.broadcast %88 : vector<1x64xf32> to vector<16x64xf32>
    %90 = arith.mulf %87, %89 : vector<16x64xf32>
    %91 = arith.truncf %90 : vector<16x64xf32> to vector<16x64xbf16>
    %c0_39 = arith.constant 0 : index
    %c0_40 = arith.constant 0 : index
    %92 = vector.load %arg6[%c0_39, %c0_40] : memref<64x256xbf16, #tpu.memory_space<vmem>>, vector<64x256xbf16>
    %cst_41 = arith.constant dense<0.000000e+00> : vector<16x256xf32>
    %93 = tpu.matmul %91, %92, %cst_41 {dimension_numbers = #tpu.dot_dimension_numbers<[1], [0], [0], [1], [0, 0, 1, 1], [], []>} : vector<16x64xbf16>, vector<64x256xbf16>, vector<16x256xf32> -> vector<16x256xf32>
    %94 = vector.extract_strided_slice %93 {offsets = [0, 0], sizes = [16, 128], strides = [1, 1]} : vector<16x256xf32> to vector<16x128xf32>
    %95 = vector.extract_strided_slice %93 {offsets = [0, 128], sizes = [16, 128], strides = [1, 1]} : vector<16x256xf32> to vector<16x128xf32>
    %96 = arith.negf %94 : vector<16x128xf32>
    %97 = math.exp %96 : vector<16x128xf32>
    %cst_42 = arith.constant 1.000000e+00 : f32
    %98 = vector.broadcast %cst_42 : f32 to vector<16x128xf32>
    %99 = arith.addf %98, %97 : vector<16x128xf32>
    %100 = arith.divf %98, %99 : vector<16x128xf32>
    %101 = arith.mulf %94, %100 : vector<16x128xf32>
    %102 = arith.mulf %101, %95 : vector<16x128xf32>
    %103 = arith.truncf %102 : vector<16x128xf32> to vector<16x128xbf16>
    %c0_43 = arith.constant 0 : index
    %c0_44 = arith.constant 0 : index
    %104 = vector.load %arg7[%c0_43, %c0_44] : memref<128x64xbf16, #tpu.memory_space<vmem>>, vector<128x64xbf16>
    %cst_45 = arith.constant dense<0.000000e+00> : vector<16x64xf32>
    %105 = tpu.matmul %103, %104, %cst_45 {dimension_numbers = #tpu.dot_dimension_numbers<[1], [0], [0], [1], [0, 0, 1, 1], [], []>} : vector<16x128xbf16>, vector<128x64xbf16>, vector<16x64xf32> -> vector<16x64xf32>
    %106 = arith.addf %77, %105 : vector<16x64xf32>
    %c0_46 = arith.constant 0 : index
    %c0_47 = arith.constant 0 : index
    %107 = vector.load %arg11[%c0_46, %c0_47] : memref<16x64xf32, #tpu.memory_space<vmem>>, vector<16x64xf32>
    tpu.vector_store %arg11[%c0_46, %c0_47], %106 {strides = array<i32>} : memref<16x64xf32, #tpu.memory_space<vmem>>, vector<16x64xf32>,
    return
  }
  func.func @transform_0(%arg0: i32) -> (i32, i32) {
    %c0_i32 = arith.constant 0 : i32
    %c0_i32_0 = arith.constant 0 : i32
    %c0_i32_1 = arith.constant 0 : i32
    return %c0_i32, %c0_i32_0 : i32, i32
  }
  func.func @transform_1(%arg0: i32) -> (i32, i32) {
    %c0_i32 = arith.constant 0 : i32
    %c0_i32_0 = arith.constant 0 : i32
    %c0_i32_1 = arith.constant 0 : i32
    return %c0_i32, %c0_i32_0 : i32, i32
  }
  func.func @transform_2(%arg0: i32) -> (i32, i32) {
    %c0_i32 = arith.constant 0 : i32
    %c0_i32_0 = arith.constant 0 : i32
    %c0_i32_1 = arith.constant 0 : i32
    return %c0_i32, %c0_i32_0 : i32, i32
  }
  func.func @transform_3(%arg0: i32) -> (i32, i32) {
    %c0_i32 = arith.constant 0 : i32
    %c0_i32_0 = arith.constant 0 : i32
    %c0_i32_1 = arith.constant 0 : i32
    return %c0_i32, %c0_i32_0 : i32, i32
  }
  func.func @transform_4(%arg0: i32) -> (i32, i32) {
    %c0_i32 = arith.constant 0 : i32
    %c0_i32_0 = arith.constant 0 : i32
    %c0_i32_1 = arith.constant 0 : i32
    return %c0_i32, %c0_i32_0 : i32, i32
  }
  func.func @transform_5(%arg0: i32) -> (i32, i32) {
    %c0_i32 = arith.constant 0 : i32
    %c0_i32_0 = arith.constant 0 : i32
    %c0_i32_1 = arith.constant 0 : i32
    return %c0_i32, %c0_i32_0 : i32, i32
  }
  func.func @transform_6(%arg0: i32) -> (i32, i32) {
    %c0_i32 = arith.constant 0 : i32
    %c0_i32_0 = arith.constant 0 : i32
    %c0_i32_1 = arith.constant 0 : i32
    return %c0_i32, %c0_i32_0 : i32, i32
  }
  func.func @transform_7(%arg0: i32) -> (i32, i32) {
    %c0_i32 = arith.constant 0 : i32
    %c0_i32_0 = arith.constant 0 : i32
    %c0_i32_1 = arith.constant 0 : i32
    return %c0_i32, %c0_i32_0 : i32, i32
  }
  func.func @transform_8(%arg0: i32) -> (i32, i32) {
    %c0_i32 = arith.constant 0 : i32
    %c0_i32_0 = arith.constant 0 : i32
    %c0_i32_1 = arith.constant 0 : i32
    return %c0_i32, %c0_i32_0 : i32, i32
  }
  func.func @transform_9(%arg0: i32) -> (i32, i32) {
    %c0_i32 = arith.constant 0 : i32
    %c0_i32_0 = arith.constant 0 : i32
    %c0_i32_1 = arith.constant 0 : i32
    return %c0_i32, %c0_i32_0 : i32, i32
  }
  func.func @transform_10(%arg0: i32) -> (i32, i32) {
    %c0_i32 = arith.constant 0 : i32
    %c0_i32_0 = arith.constant 0 : i32
    %c0_i32_1 = arith.constant 0 : i32
    return %c0_i32, %c0_i32_0 : i32, i32
  }
}

</mosaic_0001>

<bundles_post_ra>
// kernel: decoder_layer.1
= control target key start
LH: loop header
LB: loop body
LE: loop exit
PB: predicated region body
PF: predicated region fallthrough
CT: control target
= control target key end

     0   :  { %15 = vsyncpa [#allocation4], 0  ;;  %s1878_s0 = inlined_call_operand.hbm [shape: f32[16,64], index: 0, kind: input, shape index: {}]   ;;  %s1879_s1 = inlined_call_operand.vmem [shape: f32[1,64], index: 1, kind: input, shape index: {}]   ;;  %s1880_s2 = inlined_call_operand.vmem [shape: f32[1,64], index: 2, kind: input, shape index: {}]   ;;  %s1881_s3 = inlined_call_operand.vmem [shape: bf16[64,224], index: 3, kind: input, shape index: {}]   ;;  %s1882_s4 = inlined_call_operand.vmem [shape: bf16[64,64], index: 4, kind: input, shape index: {}]   ;;  %s1883_s5 = inlined_call_operand.vmem [shape: bf16[64,256], index: 5, kind: input, shape index: {}]   ;;  %s1884_s6 = inlined_call_operand.vmem [shape: bf16[128,64], index: 6, kind: input, shape index: {}]   ;;  %s1885_s7 = inlined_call_operand.hbm [shape: f32[16,96], index: 7, kind: input, shape index: {}]   ;;  %s1886_s8 = inlined_call_operand.hbm [shape: f32[16,96], index: 8, kind: input, shape index: {}]   ;;  %s1887_s9 = inlined_call_operand.vmem [shape: f32[32,16], index: 9, kind: input, shape index: {}]   ;;  %s1888_s10 = inlined_call_operand.hbm [shape: f32[16,64], index: 10, kind: output, shape index: {}]  }
   0x1   :  { %16 = vsyncpa [#allocation7], 0 }
   0x2   :  { %17 = vsyncpa [#allocation5], 0  ;;  %s1523_s13 = smov [#allocation6]   ;;  %s1524_s15 = smov [#allocation3]  }
   0x3   :  { %s47_s14 = sshll.u32 %s1523_s13, 4  ;;  %s23_s16 = sshll.u32 %s1524_s15, 4  ;;  %s48_s14 = int_to_ptr.vmem [resolvable:$true] %s47_s14  ;;  %s1593_s16 = int_to_ptr.vmem [resolvable:$true] %s23_s16 }
   0x4   :  { %s1429_s19 = scalar_lea.hbm %s1885_s7, 256 }
   0x5   :  { %p1430_p0 = scmp.ne.s32.totalorder %s1885_s7, %s1429_s19  ;;  %p1433_p1 = scmp.lt.u32.totalorder %s1429_s19, %s1885_s7 }
   0x7   :  { %p1435_p2 = pnand %p1433_p1, %p1430_p0 }
   0x9   :  { %1438 = shalt.err (!%p1435_p2)
}
   0xa   :  { %s1439_s24 = scalar_lea.vmem %s48_s14, 256  ;;  %p1444_p4 = scmp.lt.s32.totalorder %s48_s14, %s48_s14 }
   0xb   :  { %p1440_p3 = scmp.ne.s32.totalorder %s48_s14, %s1439_s24  ;;  %p1445_p5 = scmp.lt.s32.totalorder %s1439_s24, %s1439_s24 }
   0xd   :  { %p1446_p6 = por %p1445_p5, %p1444_p4 }
   0xf   :  { %p1447_p7 = pnand %p1446_p6, %p1440_p3 }
  0x11   :  { %1450 = shalt.err (!%p1447_p7)
}
  0x12   :  { %s1525_s25 = smov 128   ;;  %s1526_s26 = smov 8  }
  0x13   :  { %53 = dma.hbm_to_vmem [thread:$0]  %s1885_s7, 256, %s48_s14, [#allocation7], %s1525_s25, %s1525_s25, %s1526_s26  }
  0x14   :  { %s1451_s11 = scalar_lea.hbm %s1878_s0, 256 }
  0x15   :  { %p1452_p8 = scmp.ne.s32.totalorder %s1878_s0, %s1451_s11  ;;  %p1455_p9 = scmp.lt.u32.totalorder %s1451_s11, %s1878_s0 }
  0x17   :  { %p1457_p10 = pnand %p1455_p9, %p1452_p8 }
  0x19   :  { %1460 = shalt.err (!%p1457_p10)
}
  0x1a   :  { %s1461_s18 = scalar_lea.vmem %s1593_s16, 256  ;;  %p1466_p12 = scmp.lt.s32.totalorder %s1593_s16, %s1593_s16 }
  0x1b   :  { %p1462_p11 = scmp.ne.s32.totalorder %s1593_s16, %s1461_s18  ;;  %p1467_p13 = scmp.lt.s32.totalorder %s1461_s18, %s1461_s18 }
  0x1d   :  { %p1468_p0 = por %p1467_p13, %p1466_p12 }
  0x1f   :  { %p1469_p1 = pnand %p1468_p0, %p1462_p11 }
  0x21   :  { %1472 = shalt.err (!%p1469_p1)
}
  0x22   :  { %29 = dma.hbm_to_vmem [thread:$0]  %s1878_s0, 256, %s1593_s16, [#allocation4], %s1525_s25, %s1525_s25, %s1526_s26  }
  0x23   :  { %s1527_s19 = smov [#allocation8]   ;;  %s1473_s23 = scalar_lea.hbm %s1886_s8, 256 }
  0x24   :  { %s59_s20 = sshll.u32 %s1527_s19, 4  ;;  %p1474_p2 = scmp.ne.s32.totalorder %s1886_s8, %s1473_s23  ;;  %s60_s20 = int_to_ptr.vmem [resolvable:$true] %s59_s20 }
  0x25   :  { %p1477_p3 = scmp.lt.u32.totalorder %s1473_s23, %s1886_s8 }
  0x27   :  { %p1479_p4 = pnand %p1477_p3, %p1474_p2 }
  0x29   :  { %1482 = shalt.err (!%p1479_p4)
}
  0x2a   :  { %s1483_s30 = scalar_lea.vmem %s60_s20, 256  ;;  %p1488_p6 = scmp.lt.s32.totalorder %s60_s20, %s60_s20 }
  0x2b   :  { %p1484_p5 = scmp.ne.s32.totalorder %s60_s20, %s1483_s30  ;;  %p1489_p7 = scmp.lt.s32.totalorder %s1483_s30, %s1483_s30 }
  0x2d   :  { %p1490_p8 = por %p1489_p7, %p1488_p6 }
  0x2f   :  { %p1491_p9 = pnand %p1490_p8, %p1484_p5 }
  0x31   :  { %1494 = shalt.err (!%p1491_p9)
}
  0x32   :  { %65 = dma.hbm_to_vmem [thread:$0]  %s1886_s8, 256, %s60_s20, [#allocation7], %s1525_s25, %s1525_s25, %s1526_s26  }
  0x33   :  { %1517 = dma.done.wait [#allocation4], 256  }
  0x34   :  { %1518 = vsyncadd [#allocation4], 4294967040 }
  0x35   :  { %1519 = dma.done.wait [#allocation7], 512  }
  0x36   :  { %1520 = vsyncadd [#allocation7], 4294966784  ;;  %v1645_v0 = vld [vmem:[#allocation3] sm:$0xff]  ;;  %vm82_vm0 = vcmask 523264   ;;  %v1647_v1 = vld [vmem:[#allocation3 + $0x8] sm:$0xff]  ;;  %v1528_v11 = vmov 0  }
  0x37   :  { %v80_v2 = vmul.f32 %v1645_v0, %v1645_v0  ;;  %v81_v3 = vmul.f32 %v1647_v1, %v1647_v1  ;;  %v1345_v6 = vld [vmem:[%s1881_s3 + $0x4] ss:$8 sps:$4 sm:$0xff]   ;;  %v1347_v7 = vld [vmem:[%s1881_s3] ss:$8 sps:$4 sm:$0xff]   ;;  %v1348_v8 = vld [vmem:[%s1881_s3 + $0x14] ss:$8 sps:$4 sm:$0xff]   ;;  %191 = vmatprep.mubr.bf16.mxu1 %v1528_v11 }
  0x38   :  { %159 = vmatprep.subr.bf16.mxu1 %v1345_v6  ;;  %v1350_v9 = vld [vmem:[%s1881_s3 + $0x10] ss:$8 sps:$4 sm:$0xff]   ;;  %v1351_v10 = vld [vmem:[%s1881_s3 + $0x24] ss:$8 sps:$4 sm:$0xff]   ;;  %v1353_v12 = vld [vmem:[%s1881_s3 + $0x20] ss:$8 sps:$4 sm:$0xff]  }
  0x39   :  { %v83_v4 = vsel %vm82_vm0, %v80_v2, 0.0  ;;  %v86_v5 = vsel %vm82_vm0, %v81_v3, 0.0  ;;  %160 = vmatpush1.bf16.msra.mxu1 %v1347_v7  ;;  %v1354_v13 = vld [vmem:[%s1881_s3 + $0x34] ss:$8 sps:$4 sm:$0xff]   ;;  %v1356_v14 = vld [vmem:[%s1881_s3 + $0x30] ss:$8 sps:$4 sm:$0xff]  }
  0x3a   :  { %84 = vadd.xlane.f32.xlu0 %v83_v4  ;;  %161 = vmatprep.subr.bf16.mxu1 %v1348_v8  ;;  %v1125_v24 = vld [vmem:[%s1879_s1] ss:$0 sm:$0xff]  ;;  %v206_v30 = vld [vmem:[#allocation8] sm:$0xff]  ;;  %v203_v32 = vld [vmem:[#allocation6 + $0x8] sm:$0xff]  ;;  %vm226_vm1 = vcmask 130048   ;;  %s1529_s1 = smov 112  }
  0x3b   :  { %v202_v29 = vld [vmem:[#allocation6] sm:$0xff]  ;;  %v207_v35 = vld [vmem:[#allocation8 + $0x8] sm:$0xff]  ;;  %s1530_s3 = smov 64   ;;  %s1531_s30 = smov 48   ;;  %vm1291_vm2 = vmpackc.low %vm226_vm1, %vm226_vm1  ;;  %vm1536_vm3 = vmmov 0   ;;  %vm491_vm4 = vcmask 261248  }
  0x3c   :  { %s1532_s0 = smov 96   ;;  %v213_v60 = vld [vmem:[%s1887_s9 + $0x8] sm:$0xff]  ;;  %v212_v63 = vld [vmem:[%s1887_s9] sm:$0xff]  ;;  %v215_v7 = vld [vmem:[%s1887_s9 + $0x18] sm:$0xff]  ;;  %s1534_s7 = smov 32   ;;  %vm766_vm5 = vcmask 392448  }
  0x3d   :  { %162 = vmatpush1.bf16.msra.mxu1 %v1350_v9  ;;  %vm777_vm6 = vcmask 523648  }
  0x3e   :  { %87 = vadd.xlane.f32.xlu0 %v86_v5  ;;  %163 = vmatprep.subr.bf16.mxu1 %v1351_v10 }
  0x41   :  { %164 = vmatpush1.bf16.msra.mxu1 %v1353_v12 }
  0x42   :  { %165 = vmatprep.subr.bf16.mxu1 %v1354_v13  ;;  %v214_v13 = vld [vmem:[%s1887_s9 + $0x10] sm:$0xff]  ;;  %s1533_s9 = smov 16  }
  0x45   :  { %166 = vmatpush1.bf16.msra.mxu1 %v1356_v14 }
  0xc7   :  { %v85_v15 = vpop.xlane.xlu0 %84 }
  0xc8   :  { %v90_v16 = vmul.f32 0.015625, %v85_v15 }
  0xca   :  { %v92_v17 = vadd.f32 1e-06, %v90_v16 }
  0xcb   :  { %v88_v18 = vpop.xlane.xlu0 %87 }
  0xcc   :  { %1381 = vrsqrt.f32 %v92_v17  ;;  %v91_v19 = vmul.f32 0.015625, %v88_v18 }
  0xce   :  { %v93_v20 = vadd.f32 1e-06, %v91_v19 }
  0xd0   :  { %1383 = vrsqrt.f32 %v93_v20 }
  0xd6   :  { %v1382_v21 = vpop.eup %1381 }
  0xd7   :  { %v96_v22 = vmul.f32 %v1382_v21, %v1645_v0 }
  0xd9   :  { %v105_v26 = vmul.f32 %v1125_v24, %v96_v22 }
  0xda   :  { %v1384_v23 = vpop.eup %1383 }
  0xdb   :  { %v97_v25 = vmul.f32 %v1384_v23, %v1647_v1 }
  0xdd   :  { %v106_v27 = vmul.f32 %v1125_v24, %v97_v25 }
  0xdf   :  { %v107_v28 = vpack.c.bf16 %v106_v27, %v105_v26 }
  0xe1   :  { %1134 = vmatmul.mubr.msk.bf16.vlgmr.msra.gmra.mrb[0].mxu1 %vm82_vm0, %v107_v28 }
 0x1b4   :  { %v193_v31 = vpop.f32.mrb[0].mxu1 }
 0x1b5   :  { %v204_v33 = vmul.f32 %v202_v29, %v193_v31  ;;  %v195_v34 = vpop.f32.mrb[1].mxu1 }
 0x1b6   :  { %v208_v36 = vmul.f32 %v206_v30, %v195_v34  ;;  %v197_v37 = vpop.f32.mrb[2].mxu1 }
 0x1b7   :  { %v1686_v38 = vpack.i.bf16 %v197_v37, %v193_v31  ;;  %v205_v39 = vmul.f32 %v203_v32, %v197_v37  ;;  %v199_v40 = vpop.f32.mrb[3].mxu1 }
 0x1b8   :  { %v210_v41 = vadd.f32 %v208_v36, %v204_v33  ;;  %v209_v42 = vmul.f32 %v207_v35, %v199_v40 }
 0x1ba   :  { %v211_v43 = vadd.f32 %v209_v42, %v205_v39  ;;  %218 = vrot.lane.b32.xlu1 %v210_v41, %s1529_s1  ;;  %1222 = vmatprep.mubr.msk.f32.mxu1 %vm226_vm1, %v210_v41 }
 0x1bc   :  { %v1325_v44 = vpack.i.bf16 %v211_v43, %v210_v41 }
 0x1be   :  { %1326 = vrot.lane.b32.xlu0 %v1325_v44, %s1530_s3  ;;  %220 = vrot.lane.b32.xlu1 %v211_v43, %s1529_s1 }
 0x1c2   :  { %1331 = vrot.lane.b32.xlu1 %v1325_v44, %s1531_s30 }
 0x1c6   :  { %494 = vrot.lane.b32.xlu1 %v210_v41, %s1532_s0 }
 0x1ca   :  { %496 = vrot.lane.b32.xlu1 %v211_v43, %s1532_s0 }
 0x22c   :  { %v219_v45 = vpop.permute.xlu1 %218 }
 0x22d   :  { %498 = vrot.lane.b32.xlu1 %v219_v45, %s1532_s0 }
 0x230   :  { %v1327_v46 = vpop.permute.xlu0 %1326  ;;  %v221_v47 = vpop.permute.xlu1 %220 }
 0x231   :  { %v1329_v48 = vunpack.i.h.bf16 %v1327_v46  ;;  %v1328_v49 = vunpack.i.l.bf16 %v1327_v46  ;;  %500 = vrot.lane.b32.xlu1 %v221_v47, %s1532_s0 }
 0x233   :  { %v1290_v50 = vpack.c.bf16 %v1329_v48, %v1328_v49 }
 0x234   :  { %v1332_v51 = vpop.permute.xlu1 %1331 }
 0x235   :  { %v1334_v52 = vunpack.i.h.bf16 %v1332_v51  ;;  %v1333_v53 = vunpack.i.l.bf16 %v1332_v51  ;;  %1292 = vmatprep.subr.msk.bf16.mxu1 %vm1291_vm2, %v1290_v50 }
 0x236   :  { %1295 = vmatpush3.bf16.xpose.msk.msra.mxu1 %vm1291_vm2, %v1290_v50 }
 0x237   :  { %v1300_v54 = vpack.c.bf16 %v1334_v52, %v1333_v53 }
 0x238   :  { %v495_v55 = vpop.permute.xlu1 %494 }
 0x239   :  { %1302 = vmatprep.subr.msk.bf16.mxu0 %vm1291_vm2, %v1300_v54  ;;  %1242 = vmatprep.mubr.msk.f32.mxu0 %vm226_vm1, %v495_v55 }
 0x23a   :  { %1305 = vmatpush3.bf16.xpose.msk.msra.mxu0 %vm1291_vm2, %v1300_v54 }
 0x23c   :  { %v497_v56 = vpop.permute.xlu1 %496 }
 0x23d   :  { %1223 = vmatmul.mubr.msk.f32.vlgmr.msra.gmra.mrb[4].mxu1 %vm226_vm1, %v211_v43 }
 0x23e   :  { %1225 = vmatprep.mubr.msk.f32.mxu1 %vm226_vm1, %v219_v45 }
 0x241   :  { %1226 = vmatmul.mubr.msk.f32.gmra.mrb[6].mxu1 %vm226_vm1, %v221_v47  ;;  %1243 = vmatmul.mubr.msk.f32.vlgmr.msra.gmra.mrb[0].mxu0 %vm226_vm1, %v497_v56 }
 0x29f   :  { %v499_v57 = vpop.permute.xlu1 %498 }
 0x2a0   :  { %1245 = vmatprep.mubr.msk.f32.mxu0 %vm226_vm1, %v499_v57 }
 0x2a3   :  { %v501_v58 = vpop.permute.xlu1 %500 }
 0x2a4   :  { %1246 = vmatmul.mubr.msk.f32.gmra.mrb[2].mxu0 %vm226_vm1, %v501_v58 }
 0x310   :  { %v1224_v59 = vpop.f32.mrb[4].mxu1 }
 0x311   :  { %v325_v61 = vmul.f32 0.25, %v1224_v59  ;;  %v305_v62 = vpop.f32.mrb[5].mxu1 }
 0x312   :  { %v324_v2 = vmul.f32 0.25, %v305_v62 }
 0x313   :  { %v329_v3 = vadd.f32 %v325_v61, %v213_v60 }
 0x314   :  { %v1227_v4 = vpop.f32.mrb[6].mxu1  ;;  %v1244_v5 = vpop.f32.mrb[0].mxu0  ;;  %v328_v6 = vadd.f32 %v324_v2, %v212_v63 }
 0x315   :  { %v327_v8 = vmul.f32 0.25, %v1227_v4  ;;  %v315_v9 = vpop.f32.mrb[7].mxu1  ;;  %v584_v10 = vpop.f32.mrb[1].mxu0  ;;  %v335_v12 = vsel %vm226_vm1, %v329_v3, -inf  ;;  %v604_v14 = vmul.f32 0.25, %v1244_v5 }
 0x316   :  { %v326_v15 = vmul.f32 0.25, %v315_v9  ;;  %v603_v16 = vmul.f32 0.25, %v584_v10  ;;  %336 = vmax.xlane.f32.xlu0 %v335_v12  ;;  %v332_v17 = vsel %vm226_vm1, %v328_v6, -inf }
 0x317   :  { %333 = vmax.xlane.f32.xlu1 %v332_v17  ;;  %v331_v18 = vadd.f32 %v327_v8, %v215_v7  ;;  %v608_v22 = vadd.f32 %v604_v14, %v213_v60 }
 0x318   :  { %v330_v19 = vadd.f32 %v326_v15, %v214_v13  ;;  %v607_v23 = vadd.f32 %v603_v16, %v212_v63 }
 0x319   :  { %v341_v20 = vsel %vm226_vm1, %v331_v18, -inf  ;;  %v614_v24 = vsel %vm226_vm1, %v608_v22, -inf }
 0x31a   :  { %v338_v21 = vsel %vm226_vm1, %v330_v19, -inf  ;;  %v611_v25 = vsel %vm226_vm1, %v607_v23, -inf }
 0x31b   :  { %339 = vmax.xlane.f32.xlu0 %v338_v21  ;;  %342 = vmax.xlane.f32.xlu1 %v341_v20 }
 0x31f   :  { %615 = vmax.xlane.f32.xlu1 %v614_v24  ;;  %612 = vmax.xlane.f32.xlu0 %v611_v25 }
 0x377   :  { %v1247_v26 = vpop.f32.mrb[2].mxu0 }
 0x378   :  { %v606_v27 = vmul.f32 0.25, %v1247_v26  ;;  %v594_v28 = vpop.f32.mrb[3].mxu0 }
 0x379   :  { %v605_v29 = vmul.f32 0.25, %v594_v28 }
 0x37a   :  { %v610_v30 = vadd.f32 %v606_v27, %v215_v7 }
 0x37b   :  { %v609_v31 = vadd.f32 %v605_v29, %v214_v13 }
 0x37c   :  { %v620_v32 = vsel %vm226_vm1, %v610_v30, -inf }
 0x37d   :  { %621 = vmax.xlane.f32.xlu1 %v620_v32  ;;  %v617_v33 = vsel %vm226_vm1, %v609_v31, -inf }
 0x37e   :  { %618 = vmax.xlane.f32.xlu0 %v617_v33 }
 0x3a3   :  { %v337_v34 = vpop.xlane.xlu0 %336 }
 0x3a4   :  { %v345_v35 = vsub.f32 %v329_v3, %v337_v34  ;;  %v334_v36 = vpop.xlane.xlu1 %333 }
 0x3a5   :  { %v344_v37 = vsub.f32 %v328_v6, %v334_v36 }
 0x3a6   :  { %v350_v39 = vmul.f32 1.442695, %v345_v35 }
 0x3a7   :  { %v348_v40 = vmul.f32 1.442695, %v344_v37 }
 0x3a8   :  { %1385 = vpow2.f32 %v350_v39  ;;  %v340_v41 = vpop.xlane.xlu0 %339  ;;  %v343_v42 = vpop.xlane.xlu1 %342 }
 0x3a9   :  { %1387 = vpow2.f32 %v348_v40  ;;  %v347_v43 = vsub.f32 %v331_v18, %v343_v42  ;;  %v346_v44 = vsub.f32 %v330_v19, %v340_v41 }
 0x3ab   :  { %v354_v49 = vmul.f32 1.442695, %v347_v43  ;;  %v352_v52 = vmul.f32 1.442695, %v346_v44 }
 0x3ac   :  { %v616_v45 = vpop.xlane.xlu1 %615  ;;  %v613_v46 = vpop.xlane.xlu0 %612 }
 0x3ad   :  { %v624_v47 = vsub.f32 %v608_v22, %v616_v45  ;;  %v623_v48 = vsub.f32 %v607_v23, %v613_v46  ;;  %v1535_v46 = vmov 0.0  }
 0x3ae   :  { %1258 = vmatprep.subr.bf16.mxu0 %v1535_v46  ;;  %1266 = vmatprep.mubr.msk.bf16.mxu0 %vm1536_vm3, %v1535_v46 }
 0x3af   :  { %v629_v50 = vmul.f32 1.442695, %v624_v47  ;;  %v627_v51 = vmul.f32 1.442695, %v623_v48  ;;  %v1357_v47 = vld [vmem:[%s1882_s4] sm:$0xff]   ;;  %v1358_v48 = vld [vmem:[%s1882_s4 + $0x8] sm:$0xff]  }
 0x3b0   :  { %1259 = vmatpush3.bf16.msra.mxu0 %v1357_v47 }
 0x3b1   :  { %1389 = vpow2.f32 %v629_v50  ;;  %1260 = vmatprep.subr.bf16.mxu0 %v1535_v46 }
 0x3b2   :  { %v1719_v53 = vpop.eup %1385  ;;  %1391 = vpow2.f32 %v627_v51 }
 0x3b3   :  { %v1388_v54 = vpop.eup %1387  ;;  %1393 = vpow2.f32 %v354_v49  ;;  %v359_v55 = vsel %vm226_vm1, %v1719_v53, 0.0 }
 0x3b4   :  { %1395 = vpow2.f32 %v352_v52  ;;  %360 = vadd.xlane.f32.xlu1 %v359_v55  ;;  %v356_v56 = vsel %vm226_vm1, %v1388_v54, 0.0  ;;  %1261 = vmatpush3.bf16.msra.mxu0 %v1358_v48 }
 0x3b5   :  { %357 = vadd.xlane.f32.xlu0 %v356_v56  ;;  %1262 = vmatprep.subr.bf16.mxu0 %v1535_v46 }
 0x3bb   :  { %v1724_v57 = vpop.eup %1389 }
 0x3bc   :  { %v1726_v58 = vpop.eup %1391  ;;  %v638_v59 = vsel %vm226_vm1, %v1724_v57, 0.0 }
 0x3bd   :  { %v1730_v60 = vpop.eup %1393  ;;  %639 = vadd.xlane.f32.xlu1 %v638_v59  ;;  %v635_v61 = vsel %vm226_vm1, %v1726_v58, 0.0 }
 0x3be   :  { %v1396_v62 = vpop.eup %1395  ;;  %636 = vadd.xlane.f32.xlu0 %v635_v61  ;;  %v365_v63 = vsel %vm226_vm1, %v1730_v60, 0.0 }
 0x3bf   :  { %v362_v2 = vsel %vm226_vm1, %v1396_v62, 0.0 }
 0x3c1   :  { %366 = vadd.xlane.f32.xlu1 %v365_v63 }
 0x3c2   :  { %363 = vadd.xlane.f32.xlu0 %v362_v2 }
 0x40a   :  { %v622_v3 = vpop.xlane.xlu1 %621 }
 0x40b   :  { %v626_v4 = vsub.f32 %v610_v30, %v622_v3  ;;  %v619_v5 = vpop.xlane.xlu0 %618 }
 0x40c   :  { %v625_v6 = vsub.f32 %v609_v31, %v619_v5 }
 0x40d   :  { %v633_v7 = vmul.f32 1.442695, %v626_v4 }
 0x40e   :  { %v631_v8 = vmul.f32 1.442695, %v625_v6 }
 0x40f   :  { %1397 = vpow2.f32 %v633_v7 }
 0x410   :  { %1399 = vpow2.f32 %v631_v8 }
 0x419   :  { %v1398_v9 = vpop.eup %1397 }
 0x41a   :  { %v1400_v10 = vpop.eup %1399  ;;  %v644_v12 = vsel %vm226_vm1, %v1398_v9, 0.0 }
 0x41b   :  { %645 = vadd.xlane.f32.xlu1 %v644_v12  ;;  %v641_v13 = vsel %vm226_vm1, %v1400_v10, 0.0 }
 0x41c   :  { %642 = vadd.xlane.f32.xlu0 %v641_v13 }
 0x42c   :  { %1341 = vrot.lane.b32.xlu1 %v1686_v38, %s1533_s9 }
 0x432   :  { %1336 = vrot.lane.b32.xlu0 %v1686_v38, %s1534_s7 }
 0x441   :  { %v361_v17 = vpop.xlane.xlu1 %360 }
 0x442   :  { %v358_v14 = vpop.xlane.xlu0 %357 }
 0x443   :  { %1401 = vrcp.f32 %v358_v14 }
 0x444   :  { %1403 = vrcp.f32 %v361_v17  ;;  %v1364_v17 = vld [vmem:[%s1883_s5 + $0x10] ss:$8 sps:$4 sm:$0xff]  }
 0x44a   :  { %v640_v18 = vpop.xlane.xlu1 %639 }
 0x44b   :  { %v637_v19 = vpop.xlane.xlu0 %636 }
 0x44d   :  { %v1402_v15 = vpop.eup %1401 }
 0x44e   :  { %v372_v16 = vmul.f32 %v1402_v15, %v1388_v54  ;;  %v367_v20 = vpop.xlane.xlu1 %366  ;;  %v1404_v30 = vpop.eup %1403 }
 0x44f   :  { %v364_v21 = vpop.xlane.xlu0 %363  ;;  %v373_v33 = vmul.f32 %v1404_v30, %v1719_v53  ;;  %v1360_v53 = vld [vmem:[%s1882_s4 + $0x18] sm:$0xff]   ;;  %v1160_v30 = vld [vmem:[%s1880_s2] ss:$0 sm:$0xff] }
 0x450   :  { %1232 = vmatprep.mubr.msk.f32.mxu1 %vm226_vm1, %v372_v16  ;;  %1405 = vrcp.f32 %v364_v21  ;;  %v1366_v16 = vld [vmem:[%s1883_s5 + $0x14] ss:$8 sps:$4 sm:$0xff]   ;;  %v1370_v21 = vld [vmem:[%s1883_s5 + $0x30] ss:$8 sps:$4 sm:$0xff]  }
 0x451   :  { %1407 = vrcp.f32 %v367_v20  ;;  %v1372_v20 = vld [vmem:[%s1883_s5 + $0x34] ss:$8 sps:$4 sm:$0xff]  }
 0x452   :  { %1409 = vrcp.f32 %v637_v19  ;;  %v1367_v19 = vld [vmem:[%s1883_s5 + $0x20] ss:$8 sps:$4 sm:$0xff]  }
 0x453   :  { %1411 = vrcp.f32 %v640_v18  ;;  %v1369_v18 = vld [vmem:[%s1883_s5 + $0x24] ss:$8 sps:$4 sm:$0xff]  }
 0x45a   :  { %v1406_v31 = vpop.eup %1405 }
 0x45b   :  { %v1408_v34 = vpop.eup %1407  ;;  %v374_v35 = vmul.f32 %v1406_v31, %v1396_v62 }
 0x45c   :  { %v1410_v36 = vpop.eup %1409  ;;  %v375_v37 = vmul.f32 %v1408_v34, %v1730_v60 }
 0x45d   :  { %v1412_v39 = vpop.eup %1411  ;;  %v651_v40 = vmul.f32 %v1410_v36, %v1726_v58  ;;  %v1374_v36 = vld [vmem:[%s1884_s6 + $0x8] sm:$0xff]  }
 0x45e   :  { %v652_v42 = vmul.f32 %v1412_v39, %v1724_v57  ;;  %v1376_v39 = vld [vmem:[%s1884_s6 + $0x18] sm:$0xff]  }
 0x4a8   :  { %v646_v22 = vpop.xlane.xlu1 %645 }
 0x4a9   :  { %v643_v23 = vpop.xlane.xlu0 %642 }
 0x4aa   :  { %1413 = vrcp.f32 %v643_v23 }
 0x4ab   :  { %1415 = vrcp.f32 %v646_v22 }
 0x4ac   :  { %v1342_v24 = vpop.permute.xlu1 %1341 }
 0x4ad   :  { %v1337_v25 = vpop.permute.xlu0 %1336  ;;  %v1344_v38 = vunpack.i.h.bf16 %v1342_v24  ;;  %v1343_v26 = vunpack.i.l.bf16 %v1342_v24 }
 0x4ae   :  { %v1339_v27 = vunpack.i.h.bf16 %v1337_v25  ;;  %v1338_v28 = vunpack.i.l.bf16 %v1337_v25 }
 0x4af   :  { %v1306_v32 = vpack.c.bf16 %v1344_v38, %v1343_v26 }
 0x4b0   :  { %v1296_v29 = vpack.c.bf16 %v1339_v27, %v1338_v28 }
 0x4b2   :  { %1297 = vmatprep.subr.bf16.mxu1 %v1296_v29 }
 0x4b3   :  { %1299 = vmatpush3.bf16.msra.mxu1 %v1296_v29 }
 0x4b4   :  { %1307 = vmatprep.subr.bf16.mxu1 %v1306_v32  ;;  %v1414_v41 = vpop.eup %1413 }
 0x4b5   :  { %v1416_v43 = vpop.eup %1415  ;;  %v653_v44 = vmul.f32 %v1414_v41, %v1400_v10  ;;  %v1378_v41 = vld [vmem:[%s1884_s6 + $0x28] sm:$0xff]  }
 0x4b6   :  { %1233 = vmatmul.mubr.msk.f32.vlgmr.msra.gmra.mrb[8].mxu1 %vm226_vm1, %v373_v33  ;;  %v654_v45 = vmul.f32 %v1416_v43, %v1398_v9  ;;  %v1380_v43 = vld [vmem:[%s1884_s6 + $0x38] sm:$0xff]  }
 0x4b7   :  { %1235 = vmatprep.mubr.msk.f32.mxu1 %vm226_vm1, %v374_v35  ;;  %1309 = vmatpush3.bf16.msra.mxu1 %v1306_v32  ;;  %v1373_v35 = vld [vmem:[%s1884_s6] sm:$0xff]  }
 0x4ba   :  { %1236 = vmatmul.mubr.msk.f32.gmra.mrb[10].mxu1 %vm226_vm1, %v375_v37  ;;  %v1375_v37 = vld [vmem:[%s1884_s6 + $0x10] sm:$0xff]  }
 0x4bb   :  { %1252 = vmatprep.mubr.msk.f32.mxu1 %vm226_vm1, %v651_v40  ;;  %v1377_v40 = vld [vmem:[%s1884_s6 + $0x20] sm:$0xff]  }
 0x4be   :  { %1253 = vmatmul.mubr.msk.f32.vlgmr.msra.gmra.mrb[12].mxu1 %vm226_vm1, %v652_v42  ;;  %v1379_v42 = vld [vmem:[%s1884_s6 + $0x30] sm:$0xff]   ;;  %s1537_s6 = smov [#allocation9]  }
 0x4bf   :  { %1255 = vmatprep.mubr.msk.f32.mxu1 %vm226_vm1, %v653_v44  ;;  %s1112_s16 = sshll.u32 %s1537_s6, 4  ;;  %s1113_s16 = int_to_ptr.vmem [resolvable:$true] %s1112_s16 }
 0x4c0   :  { %s1495_s8 = scalar_lea.vmem %s1113_s16, 256  ;;  %p1500_p11 = scmp.lt.s32.totalorder %s1113_s16, %s1113_s16 }
 0x4c1   :  { %p1496_p10 = scmp.ne.s32.totalorder %s1113_s16, %s1495_s8  ;;  %p1501_p12 = scmp.lt.s32.totalorder %s1495_s8, %s1495_s8 }
 0x4c2   :  { %1256 = vmatmul.mubr.msk.f32.gmra.mrb[14].mxu1 %vm226_vm1, %v654_v45 }
 0x4c3   :  { %970 = vmatprep.mubr.bf16.mxu1 %v1528_v11  ;;  %v1359_v11 = vld [vmem:[%s1882_s4 + $0x10] sm:$0xff]   ;;  %p1502_p13 = por %p1501_p12, %p1500_p11 }
 0x4c4   :  { %1263 = vmatpush3.bf16.msra.mxu0 %v1359_v11 }
 0x4c5   :  { %1264 = vmatprep.subr.bf16.mxu0 %v1535_v46  ;;  %p1503_p0 = pnand %p1502_p13, %p1496_p10 }
 0x4c8   :  { %1265 = vmatpush3.bf16.msra.mxu0 %v1360_v53 }
 0x4c9   :  { %1270 = vmatprep.subr.bf16.mxu0 %v1535_v46 }
 0x589   :  { %v1234_v49 = vpop.f32.mrb[8].mxu1 }
 0x58a   :  { %482 = vst.msk [vmem:[#allocation2 + $0x8] sm:$0xff] %vm226_vm1, %v1234_v49  ;;  %v462_v50 = vpop.f32.mrb[9].mxu1 }
 0x58b   :  { %481 = vst.msk [vmem:[#allocation2] sm:$0xff] %vm226_vm1, %v462_v50 }
 0x58d   :  { %v1237_v51 = vpop.f32.mrb[10].mxu1 }
 0x58e   :  { %487 = vrot.lane.b32.xlu0 %v1237_v51, %s1533_s9  ;;  %v472_v52 = vpop.f32.mrb[11].mxu1 }
 0x58f   :  { %485 = vrot.lane.b32.xlu1 %v472_v52, %s1533_s9 }
 0x591   :  { %v1254_v54 = vpop.f32.mrb[12].mxu1 }
 0x592   :  { %762 = vrot.lane.b32.xlu0 %v1254_v54, %s1534_s7  ;;  %v739_v55 = vpop.f32.mrb[13].mxu1 }
 0x593   :  { %760 = vrot.lane.b32.xlu1 %v739_v55, %s1534_s7 }
 0x595   :  { %v1257_v56 = vpop.f32.mrb[14].mxu1 }
 0x596   :  { %773 = vrot.lane.b32.xlu0 %v1257_v56, %s1531_s30  ;;  %v749_v57 = vpop.f32.mrb[15].mxu1 }
 0x597   :  { %771 = vrot.lane.b32.xlu1 %v749_v57, %s1531_s30 }
 0x600   :  { %v488_v58 = vpop.permute.xlu0 %487 }
 0x601   :  { %493 = vst.msk [vmem:[#allocation2 + $0x8] sm:$0xff] %vm491_vm4, %v488_v58  ;;  %v486_v59 = vpop.permute.xlu1 %485 }
 0x602   :  { %492 = vst.msk [vmem:[#allocation2] sm:$0xff] %vm491_vm4, %v486_v59 }
 0x604   :  { %v763_v60 = vpop.permute.xlu0 %762 }
 0x605   :  { %768 = vst.msk [vmem:[#allocation2 + $0x8] sm:$0xff] %vm766_vm5, %v763_v60  ;;  %v761_v61 = vpop.permute.xlu1 %760 }
 0x606   :  { %767 = vst.msk [vmem:[#allocation2] sm:$0xff] %vm766_vm5, %v761_v61 }
 0x608   :  { %v774_v62 = vpop.permute.xlu0 %773 }
 0x609   :  { %779 = vst.msk [vmem:[#allocation2 + $0x8] sm:$0xff] %vm777_vm6, %v774_v62  ;;  %v772_v63 = vpop.permute.xlu1 %771 }
 0x60a   :  { %778 = vst.msk [vmem:[#allocation2] sm:$0xff] %vm777_vm6, %v772_v63 }
 0x610   :  { %v781_v2 = vld [vmem:[#allocation2 + $0x8] sm:$0xff] }
 0x611   :  { %v780_v3 = vld [vmem:[#allocation2] sm:$0xff] }
 0x612   :  { %v782_v4 = vpack.c.bf16 %v781_v2, %v780_v3 }
 0x614   :  { %1267 = vmatmul.mubr.msk.bf16.vlgmr.msra.gmra.mrb[4].mxu0 %vm82_vm0, %v782_v4 }
 0x615   :  { %1286 = vmatprep.mubr.msk.bf16.mxu0 %vm1536_vm3, %v1535_v46  ;;  %1271 = vmatpush3.bf16.msra.mxu0 %v1373_v35 }
 0x616   :  { %1272 = vmatprep.subr.bf16.mxu0 %v1535_v46 }
 0x619   :  { %1273 = vmatpush3.bf16.msra.mxu0 %v1374_v36 }
 0x61a   :  { %1274 = vmatprep.subr.bf16.mxu0 %v1535_v46 }
 0x61d   :  { %1275 = vmatpush3.bf16.msra.mxu0 %v1375_v37 }
 0x61e   :  { %1276 = vmatprep.subr.bf16.mxu0 %v1535_v46 }
 0x621   :  { %1277 = vmatpush3.bf16.msra.mxu0 %v1376_v39 }
 0x622   :  { %1278 = vmatprep.subr.bf16.mxu0 %v1535_v46 }
 0x625   :  { %1279 = vmatpush3.bf16.msra.mxu0 %v1377_v40 }
 0x626   :  { %1280 = vmatprep.subr.bf16.mxu0 %v1535_v46 }
 0x629   :  { %1281 = vmatpush3.bf16.msra.mxu0 %v1378_v41 }
 0x62a   :  { %1282 = vmatprep.subr.bf16.mxu0 %v1535_v46 }
 0x62d   :  { %1283 = vmatpush3.bf16.msra.mxu0 %v1379_v42 }
 0x62e   :  { %1284 = vmatprep.subr.bf16.mxu0 %v1535_v46 }
 0x631   :  { %1285 = vmatpush3.bf16.msra.mxu0 %v1380_v43 }
 0x6e7   :  { %v852_v5 = vpop.f32.mrb[4].mxu0 }
 0x6e8   :  { %v1787_v6 = vadd.f32 %v852_v5, %v1645_v0  ;;  %v1268_v7 = vpop.f32.mrb[5].mxu0  ;;  %v1363_v0 = vld [vmem:[%s1883_s5 + $0x4] ss:$8 sps:$4 sm:$0xff]  }
 0x6e9   :  { %v855_v8 = vpop.f32.mrb[6].mxu0  ;;  %938 = vmatprep.subr.bf16.mxu1 %v1363_v0 }
 0x6ea   :  { %v1790_v9 = vadd.f32 %v855_v8, %v1647_v1  ;;  %v1269_v10 = vpop.f32.mrb[7].mxu0  ;;  %v861_v12 = vmul.f32 %v1787_v6, %v1787_v6  ;;  %v1361_v1 = vld [vmem:[%s1883_s5] ss:$8 sps:$4 sm:$0xff]  }
 0x6eb   :  { %939 = vmatpush1.bf16.msra.mxu1 %v1361_v1 }
 0x6ec   :  { %v863_v13 = vsel %vm82_vm0, %v861_v12, 0.0  ;;  %v862_v14 = vmul.f32 %v1790_v9, %v1790_v9  ;;  %940 = vmatprep.subr.bf16.mxu1 %v1366_v16 }
 0x6ed   :  { %864 = vadd.xlane.f32.xlu1 %v863_v13 }
 0x6ee   :  { %v866_v15 = vsel %vm82_vm0, %v862_v14, 0.0 }
 0x6ef   :  { %867 = vadd.xlane.f32.xlu0 %v866_v15  ;;  %941 = vmatpush1.bf16.msra.mxu1 %v1364_v17 }
 0x6f0   :  { %942 = vmatprep.subr.bf16.mxu1 %v1369_v18 }
 0x6f3   :  { %943 = vmatpush1.bf16.msra.mxu1 %v1367_v19 }
 0x6f4   :  { %944 = vmatprep.subr.bf16.mxu1 %v1372_v20 }
 0x6f7   :  { %945 = vmatpush1.bf16.msra.mxu1 %v1370_v21 }
 0x77a   :  { %v865_v22 = vpop.xlane.xlu1 %864 }
 0x77b   :  { %v869_v23 = vmul.f32 0.015625, %v865_v22 }
 0x77c   :  { %v868_v24 = vpop.xlane.xlu0 %867 }
 0x77d   :  { %v871_v25 = vadd.f32 1e-06, %v869_v23  ;;  %v870_v38 = vmul.f32 0.015625, %v868_v24 }
 0x77f   :  { %1417 = vrsqrt.f32 %v871_v25  ;;  %v872_v26 = vadd.f32 1e-06, %v870_v38 }
 0x781   :  { %1419 = vrsqrt.f32 %v872_v26 }
 0x789   :  { %v1418_v27 = vpop.eup %1417 }
 0x78a   :  { %v875_v28 = vmul.f32 %v1418_v27, %v1787_v6 }
 0x78b   :  { %v1420_v29 = vpop.eup %1419 }
 0x78c   :  { %v876_v31 = vmul.f32 %v1420_v29, %v1790_v9  ;;  %v884_v32 = vmul.f32 %v1160_v30, %v875_v28 }
 0x78e   :  { %v885_v33 = vmul.f32 %v1160_v30, %v876_v31 }
 0x790   :  { %v886_v34 = vpack.c.bf16 %v885_v33, %v884_v32 }
 0x792   :  { %1169 = vmatmul.mubr.msk.bf16.vlgmr.msra.gmra.mrb[16].mxu1 %vm82_vm0, %v886_v34 }
 0x865   :  { %v972_v44 = vpop.f32.mrb[16].mxu1 }
 0x866   :  { %v1170_v45 = vmul.f32 -1.442695, %v972_v44  ;;  %v974_v47 = vpop.f32.mrb[17].mxu1 }
 0x867   :  { %v976_v48 = vpop.f32.mrb[18].mxu1 }
 0x868   :  { %1421 = vpow2.f32 %v1170_v45  ;;  %v1171_v49 = vmul.f32 -1.442695, %v976_v48  ;;  %v978_v50 = vpop.f32.mrb[19].mxu1 }
 0x86a   :  { %1423 = vpow2.f32 %v1171_v49 }
 0x872   :  { %v1422_v11 = vpop.eup %1421 }
 0x873   :  { %v987_v51 = vadd.f32 1.0, %v1422_v11 }
 0x874   :  { %v1424_v52 = vpop.eup %1423 }
 0x875   :  { %1425 = vrcp.f32 %v987_v51  ;;  %v988_v53 = vadd.f32 1.0, %v1424_v52 }
 0x877   :  { %1427 = vrcp.f32 %v988_v53 }
 0x87f   :  { %v1426_v46 = vpop.eup %1425 }
 0x880   :  { %v993_v54 = vmul.f32 %v1426_v46, %v972_v44 }
 0x881   :  { %v1428_v55 = vpop.eup %1427 }
 0x882   :  { %v995_v56 = vmul.f32 %v993_v54, %v974_v47  ;;  %v994_v57 = vmul.f32 %v1428_v55, %v976_v48 }
 0x884   :  { %v996_v58 = vmul.f32 %v994_v57, %v978_v50 }
 0x886   :  { %v997_v59 = vpack.c.bf16 %v996_v58, %v995_v56 }
 0x888   :  { %1287 = vmatmul.mubr.bf16.vlgmr.msra.gmra.mrb[8].mxu0 %v997_v59 }
 0x95b   :  { %v1096_v60 = vpop.f32.mrb[8].mxu0 }
 0x95c   :  { %v1103_v61 = vadd.f32 %v1096_v60, %v1787_v6  ;;  %v1288_v62 = vpop.f32.mrb[9].mxu0 }
 0x95d   :  { %v1099_v63 = vpop.f32.mrb[10].mxu0 }
 0x95e   :  { %1105 = vst.msk [vmem:[#allocation9] sm:$0xff] %vm82_vm0, %v1103_v61  ;;  %v1104_v2 = vadd.f32 %v1099_v63, %v1790_v9  ;;  %v1289_v3 = vpop.f32.mrb[11].mxu0 }
 0x960   :  { %1106 = vst.msk [vmem:[#allocation9 + $0x8] sm:$0xff] %vm82_vm0, %v1104_v2 }
 0x961   :  { %1506 = shalt.err (!%p1503_p0)
}
 0x962   :  { %s1507_s13 = scalar_lea.hbm %s1888_s10, 256 }
 0x963   :  { %p1508_p1 = scmp.ne.s32.totalorder %s1888_s10, %s1507_s13  ;;  %p1511_p2 = scmp.lt.u32.totalorder %s1507_s13, %s1888_s10 }
 0x965   :  { %p1513_p3 = pnand %p1511_p2, %p1508_p1 }
 0x967   :  { %1516 = shalt.err (!%p1513_p3)
}
 0x968   :  { %1118 = dma.vmem_to_hbm [thread:$0]  %s1113_s16, 256, %s1888_s10, [#allocation5], %s1525_s25, %s1525_s25, %s1526_s26  }
 0x969   :  { %1521 = dma.done.wait [#allocation5], 256  }
 0x96a   :  { %1522 = vsyncadd [#allocation5], 4294967040 }
 0x96b   :  { %1122 = vsyncpa [#allocation4], 1 }
 0x96c   :  { %1123 = vsyncpa [#allocation7], 1 }
 0x96d   :  { %1124 = vsyncpa [#allocation5], 1 }

</bundles_post_ra>
